<compile_context>
chip_gen: v6e
topology: v6e:2x2x1
jax: 0.10.0
libtpu: 0.0.40
codegen_flags: <defaults>
</compile_context>

<pallas_src>
import functools

import jax
import jax.numpy as jnp
from jax import lax
from jax.experimental import pallas as pl
from jax.experimental.pallas import tpu as pltpu


def _clip_visual_embedding_kernel(grid_ref, pos_ref, scale_ref, out_ref,
                                  acc_ref, *, eps, inv_n_frm):
    """Grid = (B, S_tiles, F_tiles); the frame axis (last) is the reduction.

    grid_ref : (TF, TS, C)   chunk of frames for one spatial tile (batch squeezed)
    pos_ref  : (TS, C)       row + col positional emb + token-type emb (f32)
    scale_ref: (2, C)        row 0 = LayerNorm gamma, row 1 = LayerNorm beta
    out_ref  : (TS, C)       normalized visual-token embeddings (batch squeezed)
    acc_ref  : (TS, C) f32   VMEM scratch accumulating the frame sum
    """
    f = pl.program_id(2)

    @pl.when(f == 0)
    def _init():
        acc_ref[...] = jnp.zeros_like(acc_ref)

    # Accumulate the frame sum one (TS, C) slice at a time so the live f32
    # temporary is a single tile (no full-block f32 materialization).
    tf = grid_ref.shape[0]

    def _accum(i, carry):
        acc_ref[...] += grid_ref[i].astype(jnp.float32)
        return carry

    lax.fori_loop(0, tf, _accum, 0, unroll=True)

    @pl.when(f == pl.num_programs(2) - 1)
    def _finalize():
        # mean over frames + positional/token-type embedding
        x = acc_ref[...] * inv_n_frm + pos_ref[...]
        # LayerNorm over the feature (lane) dim, eps inside rsqrt (torch semantics)
        mu = jnp.mean(x, axis=-1, keepdims=True)
        var = jnp.mean(jnp.square(x - mu), axis=-1, keepdims=True)
        y = (x - mu) * lax.rsqrt(var + eps)
        gamma = scale_ref[0, :][None, :]
        beta = scale_ref[1, :][None, :]
        out_ref[...] = (y * gamma + beta).astype(out_ref.dtype)


def _largest_divisor_multiple_of(n, base, cap):
    """Largest d with d | n, d % base == 0, d <= cap; None if no such d."""
    best = None
    d = base
    while d <= min(n, cap):
        if n % d == 0:
            best = d
        d += base
    return best


def _largest_divisor_leq(n, cap):
    cap = max(1, min(n, cap))
    for d in range(cap, 0, -1):
        if n % d == 0:
            return d
    return 1


class ClipVisualEmbeddingPallas:
    """JAX/Pallas port of antmmf ClipVisualEmbedding (eval-mode forward)."""

    # Per-buffer VMEM budget for the big pixel-grid input block (the pipeline
    # double-buffers it, so actual usage ~2x this). With TS<=1024 and C=256 the
    # whole footprint is ~21 MiB -> well inside the explicit 48 MiB limit below
    # (and inside v7x's 64 MiB physical VMEM).
    _INPUT_BLOCK_BUDGET_BYTES = 8 * 1024 * 1024
    _MAX_TS = 1024  # spatial rows per block
    _VMEM_LIMIT_BYTES = 48 * 1024 * 1024

    def __init__(self, max_position_embeddings=50, num_pos_feats=256,
                 layer_norm_eps=1e-12, seed=0):
        self.num_pos_feats = num_pos_feats
        self.eps = layer_norm_eps
        k = jax.random.PRNGKey(seed)
        k_row, k_col, k_tok, k_g, k_b = jax.random.split(k, 5)
        # Deterministic synthetic parameters (shapes match the nn.Module).
        self.row_position_embeddings = 0.02 * jax.random.normal(
            k_row, (max_position_embeddings, num_pos_feats), jnp.float32)
        self.col_position_embeddings = 0.02 * jax.random.normal(
            k_col, (max_position_embeddings, num_pos_feats), jnp.float32)
        self.token_type_embeddings = 0.02 * jax.random.normal(
            k_tok, (1, num_pos_feats), jnp.float32)
        self.ln_weight = 1.0 + 0.01 * jax.random.normal(
            k_g, (num_pos_feats,), jnp.float32)
        self.ln_bias = 0.01 * jax.random.normal(
            k_b, (num_pos_feats,), jnp.float32)
        # gamma/beta folded into one (2, C) slab -> single small DMA block.
        self.ln_scale = jnp.stack([self.ln_weight, self.ln_bias], axis=0)
        # Fused (S_pad, C) positional table cache, keyed on (H, W).
        self._pos_cache = {}

    def _pos_table(self, H, W, S_pad):
        key = (H, W)
        cached = self._pos_cache.get(key)
        if cached is None:
            C = self.num_pos_feats
            pos2d = (self.row_position_embeddings[:H][:, None, :]
                     + self.col_position_embeddings[:W][None, :, :])   # (H, W, C)
            pos = pos2d.reshape(H * W, C) + self.token_type_embeddings[0][None, :]
            if S_pad != H * W:
                pos = jnp.pad(pos, ((0, S_pad - H * W), (0, 0)))
            cached = jax.block_until_ready(pos)
            self._pos_cache[key] = cached
        return cached

    def _choose_tiles(self, S_pad, n_frm, C, itemsize, batch):
        # Spatial tile: multiple of 8 dividing S_pad, as large as possible.
        cap = min(S_pad, self._MAX_TS)
        if batch == 1:
            # Guarantee >= 2 spatial programs so both v7x TensorCores stream
            # DMAs even with a single-image batch.
            cap = min(cap, max(8, S_pad // 2))
        TS = (_largest_divisor_multiple_of(S_pad, 8, cap)
              or _largest_divisor_multiple_of(S_pad, 8, min(S_pad, self._MAX_TS))
              or S_pad)
        # Frame tile: as many frames as fit in the per-buffer budget.
        bytes_per_frame = TS * C * itemsize
        tf_cap = max(1, self._INPUT_BLOCK_BUDGET_BYTES // max(1, bytes_per_frame))
        TF = _largest_divisor_leq(n_frm, tf_cap)
        return TS, TF

    def __call__(self, grid, out_dtype=None):
        """grid: (B, n_frm, H, W, C) with C == num_pos_feats.

        grid may be f32 or bf16; LayerNorm math is always f32 inside the kernel.
        out_dtype defaults to grid.dtype (bf16 in -> bf16 out halves HBM bytes;
        this is the recommended production path since the kernel is HBM-bound).
        """
        B, n_frm, H, W, C = grid.shape
        assert C == self.num_pos_feats
        S = H * W
        S_pad = -(-S // 8) * 8
        out_dtype = grid.dtype if out_dtype is None else out_dtype

        pos = self._pos_table(H, W, S_pad)

        grid_flat = grid.reshape(B, n_frm, S, C)
        if S_pad != S:
            # TODO(synk): a masked tail tile would avoid this host-side pad copy.
            grid_flat = jnp.pad(grid_flat,
                                ((0, 0), (0, 0), (0, S_pad - S), (0, 0)))

        TS, TF = self._choose_tiles(S_pad, n_frm, C,
                                    grid_flat.dtype.itemsize, B)
        n_s_tiles = S_pad // TS
        n_f_tiles = n_frm // TF

        kernel = functools.partial(_clip_visual_embedding_kernel,
                                   eps=self.eps,
                                   inv_n_frm=1.0 / float(n_frm))

        in_bytes = B * n_frm * S_pad * C * grid_flat.dtype.itemsize
        out_bytes = B * S_pad * C * jnp.dtype(out_dtype).itemsize
        pos_bytes = S_pad * C * 4
        cost = pl.CostEstimate(
            flops=int(B * n_frm * S_pad * C + 8 * B * S_pad * C),
            transcendentals=int(B * S_pad),
            bytes_accessed=int(in_bytes + out_bytes + pos_bytes),
        )

        embeddings = pl.pallas_call(
            kernel,
            out_shape=jax.ShapeDtypeStruct((B, S_pad, C), out_dtype),
            grid_spec=pltpu.PrefetchScalarGridSpec(
                num_scalar_prefetch=0,
                grid=(B, n_s_tiles, n_f_tiles),
                in_specs=[
                    # pixel grid: batch squeezed, frame chunk x spatial tile
                    pl.BlockSpec((pl.Squeezed(), TF, TS, C),
                                 lambda b, s, f: (b, f, s, 0)),
                    # positional table: varies only with the spatial tile
                    pl.BlockSpec((TS, C), lambda b, s, f: (s, 0)),
                    # LayerNorm gamma/beta slab: constant -> fetched once
                    pl.BlockSpec((2, C), lambda b, s, f: (0, 0)),
                ],
                out_specs=pl.BlockSpec((pl.Squeezed(), TS, C),
                                       lambda b, s, f: (b, s, 0)),
                scratch_shapes=[pltpu.VMEM((TS, C), jnp.float32)],
            ),
            compiler_params=pltpu.CompilerParams(
                dimension_semantics=("parallel", "parallel", "arbitrary"),
                vmem_limit_bytes=self._VMEM_LIMIT_BYTES),
            cost_estimate=cost,
        )(grid_flat, pos, self.ln_scale)

        if S_pad != S:
            embeddings = embeddings[:, :S, :]

        sampled_indices = jnp.arange(S, dtype=jnp.int32)
        return embeddings, sampled_indices

    # Pure-JAX reference for validation (mirrors the torch forward, eval mode).
    def reference(self, grid):
        B, n_frm, H, W, C = grid.shape
        g = jnp.mean(grid.astype(jnp.float32), axis=1)                 # (B, H, W, C)
        pos = (self.row_position_embeddings[:H][:, None, :]
               + self.col_position_embeddings[:W][None, :, :])
        g = g + pos[None]
        tokens = g.reshape(B, H * W, C)
        tokens = tokens + self.token_type_embeddings[0][None, None, :]
        mu = jnp.mean(tokens, axis=-1, keepdims=True)
        var = jnp.mean(jnp.square(tokens - mu), axis=-1, keepdims=True)
        y = (tokens - mu) / jnp.sqrt(var + self.eps)
        return y * self.ln_weight + self.ln_bias


if __name__ == "__main__":
    # Small shapes; C=128 keeps the lane dim dense (production uses 256).
    B, n_frm, H, W, C = 2, 2, 8, 8, 128
    key = jax.random.PRNGKey(0)
    grid = jax.random.normal(key, (B, n_frm, H, W, C), jnp.float32)

    module = ClipVisualEmbeddingPallas(max_position_embeddings=50,
                                       num_pos_feats=C,
                                       layer_norm_eps=1e-12,
                                       seed=0)

    # f32 path: tight tolerance vs pure-JAX reference.
    embeddings, sampled_indices = module(grid)
    embeddings = jax.block_until_ready(embeddings)
    sampled_indices = jax.block_until_ready(sampled_indices)
    ref = module.reference(grid)
    assert embeddings.shape == (B, H * W, C)
    assert sampled_indices.shape == (H * W,)
    assert jnp.allclose(embeddings, ref, atol=1e-4, rtol=1e-4), "f32 mismatch"

    # bf16 I/O path (HBM-bytes optimization); LN math stays f32 inside kernel.
    grid_bf16 = grid.astype(jnp.bfloat16)
    emb_bf16, _ = module(grid_bf16)
    emb_bf16 = jax.block_until_ready(emb_bf16)
    ref_bf16 = module.reference(grid_bf16)
    assert emb_bf16.dtype == jnp.bfloat16
    max_err = jnp.max(jnp.abs(emb_bf16.astype(jnp.float32) - ref_bf16))
    assert float(max_err) < 0.1, f"bf16 mismatch (max err {float(max_err)})"

    # B=1 with awkward H*W (S % 8 != 0): exercises the padding path and the
    # >=2-spatial-programs cap for single-image batches.
    B2, n2, H2, W2 = 1, 3, 7, 9
    grid2 = jax.random.normal(jax.random.PRNGKey(1),
                              (B2, n2, H2, W2, C), jnp.float32)
    emb2, idx2 = module(grid2)
    emb2 = jax.block_until_ready(emb2)
    ref2 = module.reference(grid2)
    assert emb2.shape == (B2, H2 * W2, C)
    assert idx2.shape == (H2 * W2,)
    assert jnp.allclose(emb2, ref2, atol=1e-4, rtol=1e-4), "padded-S mismatch"

    print("KERNEL_OK")
</pallas_src>

<mosaic_0001>
module attributes {stable_mosaic.version = 11 : i64} {
  func.func @_clip_visual_embedding_kernel(%arg0: i32, %arg1: i32, %arg2: i32, %arg3: memref<1x2x64x128xf32, #tpu.memory_space<vmem>>, %arg4: memref<64x128xf32, #tpu.memory_space<vmem>>, %arg5: memref<2x128xf32, #tpu.memory_space<vmem>>, %arg6: memref<1x64x128xf32, #tpu.memory_space<vmem>>, %arg7: memref<64x128xf32, #tpu.memory_space<vmem>>) attributes {dimension_semantics = [#tpu.dimension_semantics<parallel>, #tpu.dimension_semantics<parallel>, #tpu.dimension_semantics<arbitrary>], iteration_bounds = array<i64: 2, 1, 1>, scalar_prefetch = 0 : i64, scratch_operands = 1 : i64, tpu.core_type = #tpu.core_type<tc>, window_params = [{transform_indices = @transform_0, window_bounds = array<i64: 1, 2, 64, 128>}, {transform_indices = @transform_1, window_bounds = array<i64: 64, 128>}, {pipeline_mode = #tpu.pipeline_mode<synchronous>, transform_indices = @transform_2, window_bounds = array<i64: 2, 128>}, {transform_indices = @transform_3, window_bounds = array<i64: 1, 64, 128>}]} {
    %c0_i32 = arith.constant 0 : i32
    %0 = arith.cmpi eq, %arg2, %c0_i32 : i32
    %1 = arith.extui %0 : i1 to i32
    %c0_i32_0 = arith.constant 0 : i32
    %2 = arith.cmpi ne, %1, %c0_i32_0 : i32
    scf.if %2 {
      %cst = arith.constant 0.000000e+00 : f32
      %18 = vector.broadcast %cst : f32 to vector<64x128xf32>
      %c0_17 = arith.constant 0 : index
      %c0_18 = arith.constant 0 : index
      %19 = vector.load %arg7[%c0_17, %c0_18] : memref<64x128xf32, #tpu.memory_space<vmem>>, vector<64x128xf32>
      tpu.vector_store %arg7[%c0_17, %c0_18], %18 {strides = array<i32>} : memref<64x128xf32, #tpu.memory_space<vmem>>, vector<64x128xf32>,
    } else {
    }
    %c0_i32_1 = arith.constant 0 : i32
    %c0 = arith.constant 0 : index
    %c0_2 = arith.constant 0 : index
    %3 = vector.load %arg7[%c0, %c0_2] : memref<64x128xf32, #tpu.memory_space<vmem>>, vector<64x128xf32>
    %c0_3 = arith.constant 0 : index
    %4 = arith.index_cast %c0_i32_1 : i32 to index
    %c0_4 = arith.constant 0 : index
    %c0_5 = arith.constant 0 : index
    %5 = vector.load %arg3[%c0_3, %4, %c0_4, %c0_5] : memref<1x2x64x128xf32, #tpu.memory_space<vmem>>, vector<1x1x64x128xf32>
    %6 = vector.shape_cast %5 : vector<1x1x64x128xf32> to vector<64x128xf32>
    %7 = arith.addf %3, %6 : vector<64x128xf32>
    %c0_6 = arith.constant 0 : index
    %c0_7 = arith.constant 0 : index
    %8 = vector.load %arg7[%c0_6, %c0_7] : memref<64x128xf32, #tpu.memory_space<vmem>>, vector<64x128xf32>
    tpu.vector_store %arg7[%c0_6, %c0_7], %7 {strides = array<i32>} : memref<64x128xf32, #tpu.memory_space<vmem>>, vector<64x128xf32>,
    %c1_i32 = arith.constant 1 : i32
    %c0_8 = arith.constant 0 : index
    %c0_9 = arith.constant 0 : index
    %9 = vector.load %arg7[%c0_8, %c0_9] : memref<64x128xf32, #tpu.memory_space<vmem>>, vector<64x128xf32>
    %c0_10 = arith.constant 0 : index
    %10 = arith.index_cast %c1_i32 : i32 to index
    %c0_11 = arith.constant 0 : index
    %c0_12 = arith.constant 0 : index
    %11 = vector.load %arg3[%c0_10, %10, %c0_11, %c0_12] : memref<1x2x64x128xf32, #tpu.memory_space<vmem>>, vector<1x1x64x128xf32>
    %12 = vector.shape_cast %11 : vector<1x1x64x128xf32> to vector<64x128xf32>
    %13 = arith.addf %9, %12 : vector<64x128xf32>
    %c0_13 = arith.constant 0 : index
    %c0_14 = arith.constant 0 : index
    %14 = vector.load %arg7[%c0_13, %c0_14] : memref<64x128xf32, #tpu.memory_space<vmem>>, vector<64x128xf32>
    tpu.vector_store %arg7[%c0_13, %c0_14], %13 {strides = array<i32>} : memref<64x128xf32, #tpu.memory_space<vmem>>, vector<64x128xf32>,
    %c2_i32 = arith.constant 2 : i32
    %c0_i32_15 = arith.constant 0 : i32
    %15 = arith.cmpi eq, %arg2, %c0_i32_15 : i32
    %16 = arith.extui %15 : i1 to i32
    %c0_i32_16 = arith.constant 0 : i32
    %17 = arith.cmpi ne, %16, %c0_i32_16 : i32
    scf.if %17 {
      %c0_17 = arith.constant 0 : index
      %c0_18 = arith.constant 0 : index
      %18 = vector.load %arg7[%c0_17, %c0_18] : memref<64x128xf32, #tpu.memory_space<vmem>>, vector<64x128xf32>
      %cst = arith.constant 5.000000e-01 : f32
      %19 = vector.broadcast %cst : f32 to vector<64x128xf32>
      %20 = arith.mulf %18, %19 : vector<64x128xf32>
      %c0_19 = arith.constant 0 : index
      %c0_20 = arith.constant 0 : index
      %21 = vector.load %arg4[%c0_19, %c0_20] : memref<64x128xf32, #tpu.memory_space<vmem>>, vector<64x128xf32>
      %22 = arith.addf %20, %21 : vector<64x128xf32>
      %cst_21 = arith.constant dense<0.000000e+00> : vector<64xf32>
      %23 = vector.multi_reduction <add>, %22, %cst_21 [1] : vector<64x128xf32> to vector<64xf32>
      %24 = vector.shape_cast %23 : vector<64xf32> to vector<64x1xf32>
      %cst_22 = arith.constant 1.280000e+02 : f32
      %25 = vector.broadcast %cst_22 : f32 to vector<64x1xf32>
      %26 = arith.divf %24, %25 : vector<64x1xf32>
      %27 = vector.broadcast %26 : vector<64x1xf32> to vector<64x128xf32>
      %28 = arith.subf %22, %27 : vector<64x128xf32>
      %29 = arith.mulf %28, %28 : vector<64x128xf32>
      %cst_23 = arith.constant dense<0.000000e+00> : vector<64xf32>
      %30 = vector.multi_reduction <add>, %29, %cst_23 [1] : vector<64x128xf32> to vector<64xf32>
      %31 = vector.shape_cast %30 : vector<64xf32> to vector<64x1xf32>
      %cst_24 = arith.constant 1.280000e+02 : f32
      %32 = vector.broadcast %cst_24 : f32 to vector<64x1xf32>
      %33 = arith.divf %31, %32 : vector<64x1xf32>
      %34 = vector.broadcast %26 : vector<64x1xf32> to vector<64x128xf32>
      %35 = arith.subf %22, %34 : vector<64x128xf32>
      %cst_25 = arith.constant 9.99999996E-13 : f32
      %36 = vector.broadcast %cst_25 : f32 to vector<64x1xf32>
      %37 = arith.addf %33, %36 : vector<64x1xf32>
      %38 = math.rsqrt %37 : vector<64x1xf32>
      %39 = vector.broadcast %38 : vector<64x1xf32> to vector<64x128xf32>
      %40 = arith.mulf %35, %39 : vector<64x128xf32>
      %c0_26 = arith.constant 0 : index
      %c0_27 = arith.constant 0 : index
      %41 = vector.load %arg5[%c0_26, %c0_27] : memref<2x128xf32, #tpu.memory_space<vmem>>, vector<1x128xf32>
      %42 = vector.shape_cast %41 : vector<1x128xf32> to vector<128xf32>
      %43 = vector.shape_cast %42 : vector<128xf32> to vector<1x128xf32>
      %c1 = arith.constant 1 : index
      %c0_28 = arith.constant 0 : index
      %44 = vector.load %arg5[%c1, %c0_28] : memref<2x128xf32, #tpu.memory_space<vmem>>, vector<1x128xf32>
      %45 = vector.shape_cast %44 : vector<1x128xf32> to vector<128xf32>
      %46 = vector.shape_cast %45 : vector<128xf32> to vector<1x128xf32>
      %47 = vector.broadcast %43 : vector<1x128xf32> to vector<64x128xf32>
      %48 = arith.mulf %40, %47 : vector<64x128xf32>
      %49 = vector.broadcast %46 : vector<1x128xf32> to vector<64x128xf32>
      %50 = arith.addf %48, %49 : vector<64x128xf32>
      %c0_29 = arith.constant 0 : index
      %c0_30 = arith.constant 0 : index
      %c0_31 = arith.constant 0 : index
      %51 = vector.load %arg6[%c0_29, %c0_30, %c0_31] : memref<1x64x128xf32, #tpu.memory_space<vmem>>, vector<1x64x128xf32>
      %52 = vector.shape_cast %51 : vector<1x64x128xf32> to vector<64x128xf32>
      %53 = vector.shape_cast %50 : vector<64x128xf32> to vector<1x64x128xf32>
      tpu.vector_store %arg6[%c0_29, %c0_30, %c0_31], %53 {strides = array<i32>} : memref<1x64x128xf32, #tpu.memory_space<vmem>>, vector<1x64x128xf32>,
    } else {
    }
    return
  }
  func.func @transform_0(%arg0: i32, %arg1: i32, %arg2: i32) -> (i32, i32, i32, i32) {
    %c0_i32 = arith.constant 0 : i32
    %c0_i32_0 = arith.constant 0 : i32
    return %arg0, %arg2, %arg1, %c0_i32 : i32, i32, i32, i32
  }
  func.func @transform_1(%arg0: i32, %arg1: i32, %arg2: i32) -> (i32, i32) {
    %c0_i32 = arith.constant 0 : i32
    %c0_i32_0 = arith.constant 0 : i32
    return %arg1, %c0_i32 : i32, i32
  }
  func.func @transform_2(%arg0: i32, %arg1: i32, %arg2: i32) -> (i32, i32) {
    %c0_i32 = arith.constant 0 : i32
    %c0_i32_0 = arith.constant 0 : i32
    %c0_i32_1 = arith.constant 0 : i32
    return %c0_i32, %c0_i32_0 : i32, i32
  }
  func.func @transform_3(%arg0: i32, %arg1: i32, %arg2: i32) -> (i32, i32, i32) {
    %c0_i32 = arith.constant 0 : i32
    %c0_i32_0 = arith.constant 0 : i32
    return %arg0, %arg1, %c0_i32 : i32, i32, i32
  }
}

</mosaic_0001>

<bundles_post_ra>
// kernel: tpu_custom_call.1
= control target key start
LH: loop header
LB: loop body
LE: loop exit
PB: predicated region body
PF: predicated region fallthrough
CT: control target
= control target key end

     0   :  { %8 = vsyncpa [#allocation4], 0  ;;  %s1153_s0 = inlined_call_operand.hbm [shape: f32[2,2,64,128], index: 0, kind: input, shape index: {}]   ;;  %s1154_s1 = inlined_call_operand.hbm [shape: f32[64,128], index: 1, kind: input, shape index: {}]   ;;  %s1155_s2 = inlined_call_operand.vmem [shape: f32[2,128], index: 2, kind: input, shape index: {}]   ;;  %s1156_s3 = inlined_call_operand.hbm [shape: f32[2,64,128], index: 3, kind: output, shape index: {}]  }
   0x1   :  { %10 = vsyncpa [#allocation4 + $0x1], 0 }
   0x2   :  { %11 = vsyncpa [#allocation7], 0 }
   0x3   :  { %12 = vsyncpa [#allocation5], 0 }
   0x4   :  { %14 = vsyncpa [#allocation5 + $0x1], 0  ;;  %s890_s12 = smov 0   ;;  %s892_s13 = smov 0  }
   0x5   :  { %s894_s14 = smov 0   ;;  %s896_s15 = smov 0  }
   0x6   :  { %s898_s16 = smov 0   ;;  %s900_s17 = smov 0  }
   0x7 LB: > { %s601_s18 = sadd.s32 4294967295, %s861_s17   ;;  %s602_s19 = sadd.s32 4294967294, %s861_s17   ;;  %s861_s17 = sphi %s900_s17, %s20_s17   ;;  %s857_s16 = sphi %s898_s16, %s1178_s16   ;;  %s853_s15 = sphi %s896_s15, %s1177_s15   ;;  %s849_s14 = sphi %s894_s14, %s1176_s14   ;;  %s845_s13 = sphi %s892_s13, %s1175_s13   ;;  %s841_s12 = sphi %s890_s12, %s1174_s12  }
   0x8   : > { %p63_p0 = scmp.ne.s32.totalorder %s845_s13, %s841_s12  ;;  %p924_p1 = scmp.eq.s32.totalorder %s601_s18, 0 }
   0x9   : > { %p928_p2 = scmp.eq.s32.totalorder %s601_s18, 1  ;;  %p142_p3 = scmp.eq.s32.totalorder %s602_s19, 1 }
   0xa   : > { %p934_p4 = por %p924_p1, %p63_p0  ;;  %p603_p5 = scmp.ge.s32.totalorder %s861_s17, 1 }
   0xb   : > { %p939_p6 = por %p142_p3, %p63_p0  ;;  %p149_p7 = scmp.lt.s32.totalorder %s861_s17, 3 }
   0xc   : > { %s1162_s22 = scalar_select %p934_p4, 1, 0 }
   0xd   : > { %s1163_s23 = scalar_select %p939_p6, 1, 0 }
   0xe   : > { %p944_p8 = pnand %p603_p5, %p149_p7  ;;  %s863_s25 = smov [#allocation6]  }
   0xf   : > { %s164_s26 = sshll.u32 %s863_s25, 4  ;;  %s39_s28 = sadd.s32 1, %s857_s16  ;;  %s165_s26 = int_to_ptr.vmem [resolvable:$true] %s164_s26 }
  0x10   : > { %p638_p9 = pneg %p944_p8  ;;  %s734_s29 = scalar_lea.vmem %s165_s26, 1024 }
  0x11   : > { %p735_p13 = scmp.ne.s32.totalorder %s165_s26, %s734_s29  ;;  %p742_p5 = scmp.lt.s32.totalorder %s165_s26, %s165_s26 }
  0x12   : > { %p953_p11 = pnand %p638_p9, %p924_p1  ;;  %p743_p7 = scmp.lt.s32.totalorder %s734_s29, %s734_s29 }
  0x14   : > { %p725_p12 = pneg %p953_p11  ;;  %p744_p6 = por %p743_p7, %p742_p5 }
  0x16   : > { %p737_p0 = pnand %p735_p13, %p725_p12 }
  0x18   : > { %p738_p3 = pneg %p737_p0 }
  0x1a   : > { %p745_p4 = pnand %p744_p6, %p738_p3 }
  0x1c   : > { %748 = shalt.err (!%p745_p4)
}
  0x1d   : > { %s1158_s30 = smov 128   ;;  %s1159_s4 = smov 8  }
  0x1e   : > { %641 = dma.hbm_to_vmem [thread:$0]  (!%p953_p11), %s1154_s1, 1024, %s165_s26, [#allocation7], %s1158_s30, %s1158_s30, %s1159_s4  }
  0x1f   : > { %p41_p4 = scmp.ge.s32.totalorder %s39_s28, 2  ;;  %s50_s7 = sadd.s32 1, %s849_s14 }
  0x20   : > { %p57_p6 = scmp.ne.s32.totalorder %s849_s14, %s845_s13  ;;  %p58_p9 = scmp.eq.s32.totalorder %s861_s17, 0 }
  0x21   : > { %s1180_s28 = smov (%p41_p4, %s39_s28), 0  ;;  %p651_p0 = scmp.lt.s32.totalorder %s861_s17, 2 }
  0x22   : > { %p974_p12 = por %p58_p9, %p57_p6  ;;  %p980_p13 = por %p928_p2, %p57_p6 }
  0x23   : > { %s43_s10 = ssub.s32 %s857_s16, %s1180_s28  ;;  %s181_s11 = sand.u32 1, %s849_s14  }
  0x24   : > { %p48_p11 = scmp.eq.s32.totalorder %s43_s10, 0  ;;  %s606_s18 = sshll.u32 %s181_s11, 7 }
  0x25   : > { %s628_s25 = sshll.u32 %s857_s16, 11  ;;  %s185_s5 = scalar_lea.vmem [#allocation3], %s606_s18 }
  0x26   : > { %s989_s19 = scalar_select %p48_p11, %s849_s14, %s50_s7  }
  0x27   : > { %s196_s29 = scalar_lea.hbm %s1153_s0, %s628_s25  ;;  %s197_s6 = sshll.u32 %s185_s5, 4  ;;  %s198_s6 = int_to_ptr.vmem [resolvable:$true] %s197_s6 }
  0x28   : > { %p997_p2 = pnand %p651_p0, %p974_p12  ;;  %s182_s30 = scalar_lea.sflag [#allocation4], %s181_s11 }
  0x29   : > { %s762_s10 = scalar_lea.vmem %s198_s6, 2048  ;;  %s866_s7 = smov [#allocation3]  }
  0x2a   : > { %p751_p3 = pneg %p997_p2  ;;  %p763_p5 = scmp.ne.s32.totalorder %s198_s6, %s762_s10 }
  0x2b   : > { %s767_s4 = sshll.u32 %s866_s7, 4  ;;  %s768_s4 = int_to_ptr.vmem [resolvable:$false] %s767_s4 }
  0x2c   : > { %p765_p7 = pnand %p763_p5, %p751_p3  ;;  %s769_s25 = scalar_lea.vmem %s768_s4, 4096 }
  0x2d   : > { %p770_p6 = scmp.lt.s32.totalorder %s198_s6, %s768_s4  ;;  %p771_p9 = scmp.lt.s32.totalorder %s769_s25, %s762_s10 }
  0x2e   : > { %p766_p4 = pneg %p765_p7 }
  0x2f   : > { %p772_p11 = por %p771_p9, %p770_p6 }
  0x31   : > { %p773_p10 = pnand %p772_p11, %p766_p4 }
  0x33   : > { %776 = shalt.err (!%p773_p10)
}
  0x34   : > { %s1169_s8 = smov 8   ;;  %s1170_s18 = smov 128  }
  0x35   : > { %645 = dma.hbm_to_vmem [thread:$0]  (!%p997_p2), %s196_s29, 2048, %s198_s6, %s182_s30, %s1170_s18, %s1170_s18, %s1169_s8  }
  0x36   : > { %209 = sbr.rel (%p944_p8) target bundleno = 406 (0x196), region = 32  ;;  %s1011_s11 = sand.u32 (!%p944_p8), 1, %s845_s13  }
  0x37   : > { %s610_s4 = sshll.u32 (!%p944_p8), %s1011_s11, 7  ;;  %s212_s26 = scalar_lea.sflag (!%p944_p8), [#allocation4], %s1011_s11 }
  0x38   : > { %s1015_s27 = scalar_lea.vmem (!%p944_p8), [#allocation3], %s610_s4  ;;  %p1171_p10 = scmp.ne.s32.totalorder (!%p944_p8), %s1162_s22, 0 }
  0x3b   : > { %828 = dma.done.wait (%p1171_p10), %s212_s26, 2048  }
  0x3c   : > { %830 = vsyncadd (%p1171_p10), %s212_s26, 4294965248 }
  0x3d   : > { %832 = dma.done.wait (%p924_p1), [#allocation7], 1024  }
  0x3e   : > { %834 = vsyncadd (%p924_p1), [#allocation7], 4294966272  ;;  %v266_v0 = vld [vmem:[%s1015_s27] sm:$0xff]  ;;  %v268_v3 = vld [vmem:[%s1015_s27 + $0x10] sm:$0xff]  ;;  %s612_s24 = sshll.u32 %s1011_s11, 6  ;;  %s629_s6 = sshll.u32 %s853_s15, 10 }
  0x3f   : > { %v613_v1 = vld [vmem:[%s1015_s27 + $0x40] sm:$0xff]  ;;  %v615_v4 = vld [vmem:[%s1015_s27 + $0x50] sm:$0xff]  ;;  %v267_v7 = vld [vmem:[%s1015_s27 + $0x8] sm:$0xff]  ;;  %s1083_s5 = scalar_lea.vmem [#allocation8], %s612_s24  ;;  %s1102_s25 = scalar_lea.hbm %s1156_s3, %s629_s6 }
  0x40   : > { %v307_v2 = vadd.f32 %v613_v1, %v266_v0  ;;  %v342_v5 = vld [vmem:[#allocation6] sm:$0xff]  ;;  %v309_v6 = vadd.f32 %v615_v4, %v268_v3  ;;  %v614_v8 = vld [vmem:[%s1015_s27 + $0x48] sm:$0xff]  ;;  %v344_v10 = vld [vmem:[#allocation6 + $0x10] sm:$0xff]  ;;  %s497_s21 = sshll.u32 %s1083_s5, 4  ;;  %s482_s8 = scalar_lea.sflag [#allocation5], %s1011_s11  ;;  %s1104_s21 = int_to_ptr.vmem [resolvable:$true] %s497_s21 }
  0x41   : > { %v308_v11 = vadd.f32 %v614_v8, %v267_v7  ;;  %v269_v12 = vld [vmem:[%s1015_s27 + $0x18] sm:$0xff]  ;;  %v343_v15 = vld [vmem:[#allocation6 + $0x8] sm:$0xff]  ;;  %v270_v17 = vld [vmem:[%s1015_s27 + $0x20] sm:$0xff]  ;;  %s777_s18 = scalar_lea.vmem %s1104_s21, 1024  ;;  %s867_s15 = smov [#allocation8]  }
  0x42   : > { %v334_v9 = vmul.f32 0.5, %v307_v2  ;;  %v616_v13 = vld [vmem:[%s1015_s27 + $0x58] sm:$0xff]  ;;  %v336_v14 = vmul.f32 0.5, %v309_v6  ;;  %v617_v18 = vld [vmem:[%s1015_s27 + $0x60] sm:$0xff]  ;;  %v271_v23 = vld [vmem:[%s1015_s27 + $0x28] sm:$0xff]  ;;  %p778_p1 = scmp.ne.s32.totalorder %s1104_s21, %s777_s18  ;;  %s781_s4 = sshll.u32 %s867_s15, 4  ;;  %s782_s4 = int_to_ptr.vmem [resolvable:$false] %s781_s4 }
  0x43   : > { %v310_v16 = vadd.f32 %v616_v13, %v269_v12  ;;  %v335_v20 = vmul.f32 0.5, %v308_v11  ;;  %v345_v21 = vld [vmem:[#allocation6 + $0x18] sm:$0xff]  ;;  %v311_v22 = vadd.f32 %v617_v18, %v270_v17  ;;  %v618_v24 = vld [vmem:[%s1015_s27 + $0x68] sm:$0xff]  ;;  %v272_v28 = vld [vmem:[%s1015_s27 + $0x30] sm:$0xff]  ;;  %s783_s26 = scalar_lea.vmem %s782_s4, 2048  ;;  %p784_p0 = scmp.lt.s32.totalorder %s1104_s21, %s782_s4 }
  0x44   : > { %v350_v19 = vadd.f32 %v342_v5, %v334_v9  ;;  %v352_v25 = vadd.f32 %v344_v10, %v336_v14  ;;  %v312_v27 = vadd.f32 %v618_v24, %v271_v23  ;;  %v619_v29 = vld [vmem:[%s1015_s27 + $0x70] sm:$0xff]  ;;  %v273_v33 = vld [vmem:[%s1015_s27 + $0x38] sm:$0xff]  ;;  %v346_v36 = vld [vmem:[#allocation6 + $0x20] sm:$0xff]  ;;  %p779_p8 = pnand %p778_p1, %p980_p13  ;;  %p785_p2 = scmp.lt.s32.totalorder %s783_s26, %s777_s18 }
  0x45   : > { %v337_v26 = vmul.f32 0.5, %v310_v16  ;;  %v351_v30 = vadd.f32 %v343_v15, %v335_v20  ;;  %v338_v31 = vmul.f32 0.5, %v311_v22  ;;  %v313_v32 = vadd.f32 %v619_v29, %v272_v28  ;;  %v620_v34 = vld [vmem:[%s1015_s27 + $0x78] sm:$0xff]  ;;  %v347_v39 = vld [vmem:[#allocation6 + $0x28] sm:$0xff]  ;;  %v348_v43 = vld [vmem:[#allocation6 + $0x30] sm:$0xff] }
  0x46   : > { %358 = vadd.xlane.f32.xlu0 %v350_v19  ;;  %362 = vadd.xlane.f32.xlu1 %v352_v25  ;;  %v339_v37 = vmul.f32 0.5, %v312_v27  ;;  %v314_v38 = vadd.f32 %v620_v34, %v273_v33  ;;  %v349_v45 = vld [vmem:[#allocation6 + $0x38] sm:$0xff]  ;;  %p780_p12 = pneg %p779_p8  ;;  %p786_p3 = por %p785_p2, %p784_p0 }
  0x47   : > { %v353_v35 = vadd.f32 %v345_v21, %v337_v26  ;;  %v354_v40 = vadd.f32 %v346_v36, %v338_v31  ;;  %v340_v41 = vmul.f32 0.5, %v313_v32 }
  0x48   : > { %v355_v42 = vadd.f32 %v347_v39, %v339_v37  ;;  %v341_v44 = vmul.f32 0.5, %v314_v38  ;;  %p787_p5 = pnand %p786_p3, %p780_p12 }
  0x49   : > { %v356_v46 = vadd.f32 %v348_v43, %v340_v41  ;;  %v622_v43 = vld [vmem:[%s1155_s2 + $0x1] ss:$0 sm:$0xff] }
  0x4a   : > { %360 = vadd.xlane.f32.xlu0 %v351_v30  ;;  %364 = vadd.xlane.f32.xlu1 %v353_v35  ;;  %v357_v47 = vadd.f32 %v349_v45, %v341_v44 }
  0x4e   : > { %366 = vadd.xlane.f32.xlu0 %v354_v40  ;;  %368 = vadd.xlane.f32.xlu1 %v355_v42 }
  0x52   : > { %370 = vadd.xlane.f32.xlu0 %v356_v46  ;;  %372 = vadd.xlane.f32.xlu1 %v357_v47 }
  0xcf   : > { %v359_v48 = vpop.xlane.xlu0 %358  ;;  %v363_v50 = vpop.xlane.xlu1 %362 }
  0xd0   : > { %v375_v49 = vmul.f32 0.0078125, %v359_v48  ;;  %v377_v51 = vmul.f32 0.0078125, %v363_v50 }
  0xd2   : > { %v1041_v52 = vsub.f32 %v350_v19, %v375_v49  ;;  %v1043_v53 = vsub.f32 %v352_v25, %v377_v51 }
  0xd3   : > { %v361_v54 = vpop.xlane.xlu0 %360  ;;  %v365_v57 = vpop.xlane.xlu1 %364 }
  0xd4   : > { %v376_v55 = vmul.f32 0.0078125, %v361_v54  ;;  %v391_v56 = vmul.f32 %v1041_v52, %v1041_v52  ;;  %v378_v58 = vmul.f32 0.0078125, %v365_v57  ;;  %v393_v60 = vmul.f32 %v1043_v53, %v1043_v53 }
  0xd6   : > { %v1047_v59 = vsub.f32 %v351_v30, %v376_v55  ;;  %399 = vadd.xlane.f32.xlu0 %v391_v56  ;;  %v1051_v61 = vsub.f32 %v353_v35, %v378_v58 }
  0xd7   : > { %v367_v62 = vpop.xlane.xlu0 %366  ;;  %v369_v1 = vpop.xlane.xlu1 %368 }
  0xd8   : > { %v379_v63 = vmul.f32 0.0078125, %v367_v62  ;;  %v392_v0 = vmul.f32 %v1047_v59, %v1047_v59  ;;  %v380_v2 = vmul.f32 0.0078125, %v369_v1  ;;  %v394_v4 = vmul.f32 %v1051_v61, %v1051_v61 }
  0xda   : > { %v1055_v3 = vsub.f32 %v354_v40, %v379_v63  ;;  %403 = vadd.xlane.f32.xlu0 %v393_v60  ;;  %401 = vadd.xlane.f32.xlu1 %v392_v0  ;;  %v1059_v5 = vsub.f32 %v355_v42, %v380_v2  ;;  %v621_v40 = vld [vmem:[%s1155_s2] ss:$0 sm:$0xff] }
  0xdb   : > { %v371_v6 = vpop.xlane.xlu0 %370  ;;  %v373_v9 = vpop.xlane.xlu1 %372 }
  0xdc   : > { %v381_v7 = vmul.f32 0.0078125, %v371_v6  ;;  %v395_v8 = vmul.f32 %v1055_v3, %v1055_v3  ;;  %v382_v10 = vmul.f32 0.0078125, %v373_v9  ;;  %v396_v12 = vmul.f32 %v1059_v5, %v1059_v5 }
  0xde   : > { %v1063_v11 = vsub.f32 %v356_v46, %v381_v7  ;;  %405 = vadd.xlane.f32.xlu1 %v394_v4  ;;  %407 = vadd.xlane.f32.xlu0 %v395_v8  ;;  %v1067_v13 = vsub.f32 %v357_v47, %v382_v10 }
  0xe0   : > { %v397_v14 = vmul.f32 %v1063_v11, %v1063_v11  ;;  %v398_v15 = vmul.f32 %v1067_v13, %v1067_v13 }
  0xe2   : > { %409 = vadd.xlane.f32.xlu1 %v396_v12  ;;  %411 = vadd.xlane.f32.xlu0 %v397_v14 }
  0xe6   : > { %413 = vadd.xlane.f32.xlu1 %v398_v15 }
 0x15f   : > { %v400_v16 = vpop.xlane.xlu0 %399 }
 0x160   : > { %v415_v17 = vmul.f32 0.0078125, %v400_v16 }
 0x162   : > { %v423_v18 = vadd.f32 1e-12, %v415_v17 }
 0x163   : > { %v402_v19 = vpop.xlane.xlu1 %401  ;;  %v404_v20 = vpop.xlane.xlu0 %403 }
 0x164   : > { %707 = vrsqrt.f32 %v423_v18  ;;  %v416_v21 = vmul.f32 0.0078125, %v402_v19  ;;  %v417_v22 = vmul.f32 0.0078125, %v404_v20 }
 0x166   : > { %v424_v23 = vadd.f32 1e-12, %v416_v21  ;;  %v425_v24 = vadd.f32 1e-12, %v417_v22 }
 0x167   : > { %v406_v25 = vpop.xlane.xlu1 %405  ;;  %v408_v26 = vpop.xlane.xlu0 %407 }
 0x168   : > { %709 = vrsqrt.f32 %v424_v23  ;;  %v418_v27 = vmul.f32 0.0078125, %v406_v25  ;;  %v419_v28 = vmul.f32 0.0078125, %v408_v26 }
 0x169   : > { %711 = vrsqrt.f32 %v425_v24 }
 0x16a   : > { %v426_v29 = vadd.f32 1e-12, %v418_v27  ;;  %v427_v30 = vadd.f32 1e-12, %v419_v28 }
 0x16b   : > { %v410_v31 = vpop.xlane.xlu1 %409  ;;  %v412_v32 = vpop.xlane.xlu0 %411 }
 0x16c   : > { %713 = vrsqrt.f32 %v426_v29  ;;  %v420_v33 = vmul.f32 0.0078125, %v410_v31  ;;  %v421_v34 = vmul.f32 0.0078125, %v412_v32 }
 0x16d   : > { %715 = vrsqrt.f32 %v427_v30 }
 0x16e   : > { %v428_v35 = vadd.f32 1e-12, %v420_v33  ;;  %v429_v36 = vadd.f32 1e-12, %v421_v34 }
 0x16f   : > { %v414_v37 = vpop.xlane.xlu1 %413 }
 0x170   : > { %717 = vrsqrt.f32 %v428_v35  ;;  %v422_v38 = vmul.f32 0.0078125, %v414_v37 }
 0x171   : > { %v708_v39 = vpop.eup %707  ;;  %719 = vrsqrt.f32 %v429_v36 }
 0x172   : > { %v439_v41 = vmul.f32 %v708_v39, %v1041_v52  ;;  %v430_v42 = vadd.f32 1e-12, %v422_v38 }
 0x174   : > { %v453_v44 = vmul.f32 %v621_v40, %v439_v41  ;;  %721 = vrsqrt.f32 %v430_v42 }
 0x175   : > { %v710_v45 = vpop.eup %709 }
 0x176   : > { %v712_v46 = vpop.eup %711  ;;  %v465_v47 = vadd.f32 %v622_v43, %v453_v44  ;;  %v440_v48 = vmul.f32 %v710_v45, %v1047_v59 }
 0x177   : > { %v441_v49 = vmul.f32 %v712_v46, %v1043_v53 }
 0x178   : > { %473 = vst [vmem:[%s1083_s5] sm:$0xff] %v465_v47  ;;  %v454_v50 = vmul.f32 %v621_v40, %v440_v48 }
 0x179   : > { %v714_v51 = vpop.eup %713  ;;  %v455_v52 = vmul.f32 %v621_v40, %v441_v49 }
 0x17a   : > { %v716_v54 = vpop.eup %715  ;;  %v466_v55 = vadd.f32 %v622_v43, %v454_v50  ;;  %v442_v56 = vmul.f32 %v714_v51, %v1051_v61 }
 0x17b   : > { %v467_v57 = vadd.f32 %v622_v43, %v455_v52  ;;  %v443_v58 = vmul.f32 %v716_v54, %v1055_v3 }
 0x17c   : > { %474 = vst [vmem:[%s1083_s5 + $0x8] sm:$0xff] %v466_v55  ;;  %v456_v53 = vmul.f32 %v621_v40, %v442_v56 }
 0x17d   : > { %v718_v59 = vpop.eup %717  ;;  %475 = vst [vmem:[%s1083_s5 + $0x10] sm:$0xff] %v467_v57  ;;  %v457_v60 = vmul.f32 %v621_v40, %v443_v58 }
 0x17e   : > { %v720_v62 = vpop.eup %719  ;;  %v468_v63 = vadd.f32 %v622_v43, %v456_v53  ;;  %v444_v0 = vmul.f32 %v718_v59, %v1059_v5 }
 0x17f   : > { %v469_v1 = vadd.f32 %v622_v43, %v457_v60  ;;  %v445_v61 = vmul.f32 %v720_v62, %v1063_v11 }
 0x180   : > { %476 = vst [vmem:[%s1083_s5 + $0x18] sm:$0xff] %v468_v63  ;;  %v458_v2 = vmul.f32 %v621_v40, %v444_v0 }
 0x181   : > { %v722_v3 = vpop.eup %721  ;;  %477 = vst [vmem:[%s1083_s5 + $0x20] sm:$0xff] %v469_v1  ;;  %v459_v4 = vmul.f32 %v621_v40, %v445_v61 }
 0x182   : > { %v470_v6 = vadd.f32 %v622_v43, %v458_v2  ;;  %v446_v7 = vmul.f32 %v722_v3, %v1067_v13 }
 0x183   : > { %v471_v8 = vadd.f32 %v622_v43, %v459_v4 }
 0x184   : > { %478 = vst [vmem:[%s1083_s5 + $0x28] sm:$0xff] %v470_v6  ;;  %v460_v9 = vmul.f32 %v621_v40, %v446_v7 }
 0x185   : > { %479 = vst [vmem:[%s1083_s5 + $0x30] sm:$0xff] %v471_v8 }
 0x186   : > { %v472_v5 = vadd.f32 %v622_v43, %v460_v9 }
 0x188   : > { %480 = vst [vmem:[%s1083_s5 + $0x38] sm:$0xff] %v472_v5 }
 0x189   : > { %790 = shalt.err (!%p787_p5)
}
 0x18a   : > { %s791_s27 = scalar_lea.hbm %s1102_s25, 1024  ;;  %s795_s24 = scalar_lea.hbm %s1156_s3, 2048 }
 0x18b   : > { %p792_p7 = scmp.ne.s32.totalorder %s1102_s25, %s791_s27  ;;  %p796_p9 = scmp.lt.s32.totalorder %s1102_s25, %s1156_s3 }
 0x18c   : > { %p797_p11 = scmp.lt.s32.totalorder %s795_s24, %s791_s27 }
 0x18d   : > { %p793_p4 = pnand %p792_p7, %p980_p13 }
 0x18e   : > { %p798_p10 = por %p797_p11, %p796_p9 }
 0x18f   : > { %p794_p6 = pneg %p793_p4 }
 0x191   : > { %p799_p1 = pnand %p798_p10, %p794_p6 }
 0x193   : > { %802 = shalt.err (!%p799_p1)
}
 0x194   : > { %s868_s5 = smov 128   ;;  %s869_s6 = smov 8  }
 0x195   : > { %636 = dma.vmem_to_hbm [thread:$0]  (%p980_p13), %s1104_s21, 1024, %s1102_s25, %s482_s8, %s868_s5, %s868_s5, %s869_s6  }
 0x196 PF: > { %s512_s10 = sand.u32 1, %s841_s12   ;;  %p1172_p8 = scmp.ne.s32.totalorder %s1163_s23, 0 }
 0x197   : > { %p1173_p12 = scmp.ge.s32.totalorder %s861_s17, 2  ;;  %s513_s7 = scalar_lea.sflag [#allocation5], %s512_s10 }
 0x199   : > { %p647_p0 = pnand %p1173_p12, %p1172_p8 }
 0x19b   : > { %p648_p2 = pneg %p647_p0 }
 0x19d   : > { %836 = dma.done.wait (%p648_p2), %s513_s7, 1024  }
 0x19e   : > { %838 = vsyncadd (%p648_p2), %s513_s7, 4294966272  ;;  %s20_s17 = sadd.s32 1, %s861_s17   ;;  %s1174_s12 = smov %s845_s13 }
 0x19f   : > { %p17_p3 = scmp.ge.s32.totalorder %s20_s17, 4   ;;  %s1175_s13 = smov %s849_s14 }
 0x1a0   : > { %s1176_s14 = smov %s989_s19  ;;  %s1177_s15 = smov %s857_s16 }
 0x1a1   : > { %s1178_s16 = smov %s1180_s28  ;;  %19 = sbr.rel (!%p17_p3) target bundleno = 7 (0x7), region = 91 }
 0x1a6   :  { %518 = vsyncpa [#allocation4], 1 }
 0x1a7   :  { %520 = vsyncpa [#allocation4 + $0x1], 1 }
 0x1a8   :  { %521 = vsyncpa [#allocation7], 1 }
 0x1a9   :  { %522 = vsyncpa [#allocation5], 1 }
 0x1aa   :  { %524 = vsyncpa [#allocation5 + $0x1], 1 }

</bundles_post_ra>
